<compile_context>
chip_gen: v6e
topology: v6e:2x2x1
jax: 0.10.0
libtpu: 0.0.40
codegen_flags: <defaults>
</compile_context>

<pallas_src>
import functools

import jax
import jax.numpy as jnp
from jax import lax
from jax.experimental import pallas as pl
from jax.experimental.pallas import tpu as pltpu


N_PREFIX = 5      # first 5 tokens are raw float features (torch: input[:5].float())
PREFIX_PAD = 8    # sublane-padded prefix width (rows >= N_PREFIX of w1_prefix are zero)
LANE = 128


def _round_up(x, m):
    return (x + m - 1) // m * m


# --------------------------------------------------------------------------- kernel
def policy_kernel(tok_ref, emb_ref, w1p_ref, w1e_ref, b1_ref, w2_ref, b2_ref,
                  w3_ref, b3_ref, o_ref, *, n_prefix, output_size):
    """Fused Policy forward for one (TILE_B, L) tile of token sequences."""
    tok = tok_ref[...]                                   # (TB, L) int32
    tb = tok.shape[0]
    vocab = emb_ref.shape[0]
    n_emb_tok = w1e_ref.shape[0]                         # number of embedded tokens (L - 5)

    # ---- layer 1, partitioned so the embedding gather runs on the MXU ----------
    # Prefix contribution: w1p rows >= n_prefix are zero, so the extra int columns
    # pulled in for sublane alignment contribute nothing.
    prefix = tok[:, : w1p_ref.shape[0]].astype(jnp.float32)            # (TB, 8)
    h1 = jnp.dot(prefix, w1p_ref[...], preferred_element_type=jnp.float32)

    emb_tab = emb_ref[...]                               # (V, E) f32
    for k in range(n_emb_tok):                           # static, fully unrolled
        ids = tok[:, n_prefix + k : n_prefix + k + 1]    # (TB, 1) int32
        onehot = (ids == lax.broadcasted_iota(jnp.int32, (tb, vocab), 1)
                  ).astype(jnp.float32)                  # (TB, V)
        e_k = jnp.dot(onehot, emb_tab, preferred_element_type=jnp.float32)      # (TB, E)
        h1 = h1 + jnp.dot(e_k, w1e_ref[k], preferred_element_type=jnp.float32)  # (TB, H)

    h1 = jnp.maximum(h1 + b1_ref[...], 0.0)              # ReLU
    # TODO(synk): nn.Dropout treated as identity (inference/eval forward only).

    # ---- layer 2 + sigmoid (stable tanh form, runs on the EUP) ------------------
    z2 = jnp.dot(h1, w2_ref[...], preferred_element_type=jnp.float32) + b2_ref[...]
    h2 = 0.5 * (jnp.tanh(0.5 * z2) + 1.0)

    # ---- layer 3 + softmax over the lane-padded feature axis --------------------
    z3 = jnp.dot(h2, w3_ref[...], preferred_element_type=jnp.float32) + b3_ref[...]
    lane_idx = lax.broadcasted_iota(jnp.int32, z3.shape, 1)
    z3 = jnp.where(lane_idx < output_size, z3, -1e30)    # mask padded output lanes
    m = jnp.max(z3, axis=-1, keepdims=True)
    e = jnp.exp(z3 - m)
    denom = jnp.sum(e, axis=-1, keepdims=True)
    o_ref[...] = e * pl.reciprocal(denom, approx=True)


# --------------------------------------------------------------------------- params
def make_policy_params(key, vocab_size, emb_size, input_size, hidden_size, output_size):
    """Parameters in the PyTorch nn.Module layout: Linear weights are (out_features, in_features)."""
    ks = jax.random.split(key, 7)
    scale = 0.1
    emb = jax.random.normal(ks[0], (vocab_size, emb_size), jnp.float32) * scale
    emb = emb.at[0].set(0.0)                             # padding_idx=0
    return {
        "emb": emb,
        "w1": jax.random.normal(ks[1], (hidden_size, input_size), jnp.float32) * scale,
        "b1": jax.random.normal(ks[2], (hidden_size,), jnp.float32) * scale,
        "w2": jax.random.normal(ks[3], (hidden_size // 2, hidden_size), jnp.float32) * scale,
        "b2": jax.random.normal(ks[4], (hidden_size // 2,), jnp.float32) * scale,
        "w3": jax.random.normal(ks[5], (output_size, hidden_size // 2), jnp.float32) * scale,
        "b3": jax.random.normal(ks[6], (output_size,), jnp.float32) * scale,
    }


def prepare_kernel_params(params, n_prefix=N_PREFIX):
    """One-time weight re-layout for the kernel (outside the hot path)."""
    emb = params["emb"].astype(jnp.float32)
    _, emb_size = emb.shape
    w1t = params["w1"].T.astype(jnp.float32)             # (input_size, H)
    input_size, hidden = w1t.shape
    n_emb_tok = (input_size - n_prefix) // emb_size
    assert n_prefix + n_emb_tok * emb_size == input_size

    w1_prefix = jnp.zeros((PREFIX_PAD, hidden), jnp.float32).at[:n_prefix].set(w1t[:n_prefix])
    w1_emb = w1t[n_prefix:].reshape(n_emb_tok, emb_size, hidden)

    hidden2 = params["w2"].shape[0]
    output_size = params["w3"].shape[0]
    out_pad = _round_up(output_size, LANE)               # lane-dense output stores

    kp = {
        "emb": emb,
        "w1_prefix": w1_prefix,                                          # (8, H)
        "w1_emb": w1_emb,                                                # (T, E, H)
        "b1": params["b1"].reshape(1, hidden).astype(jnp.float32),
        "w2": params["w2"].T.astype(jnp.float32),                        # (H, H//2)
        "b2": params["b2"].reshape(1, hidden2).astype(jnp.float32),
        "w3": jnp.pad(params["w3"].T.astype(jnp.float32),
                      ((0, 0), (0, out_pad - output_size))),             # (H//2, 128)
        "b3": jnp.pad(params["b3"].astype(jnp.float32),
                      (0, out_pad - output_size)).reshape(1, out_pad),   # (1, 128)
    }
    return kp, output_size


# --------------------------------------------------------------------------- forward
@functools.partial(jax.jit, static_argnames=("output_size", "n_prefix", "tile_b"))
def policy_forward(tokens, kp, *, output_size, n_prefix=N_PREFIX, tile_b=8):
    """Batched Policy forward. tokens: (L,) or (B, L) int32. Returns softmax probs."""
    single = tokens.ndim == 1
    tok2d = tokens[None, :] if single else tokens
    b, seq_len = tok2d.shape
    assert seq_len >= PREFIX_PAD, "kernel expects at least 8 tokens (5 prefix + >=3 embedded)"

    b_pad = _round_up(b, tile_b)
    if b_pad != b:
        tok2d = jnp.pad(tok2d, ((0, b_pad - b), (0, 0)))

    out_pad = kp["w3"].shape[1]
    kernel = functools.partial(policy_kernel, n_prefix=n_prefix, output_size=output_size)

    out = pl.pallas_call(
        kernel,
        out_shape=jax.ShapeDtypeStruct((b_pad, out_pad), jnp.float32),
        grid=(b_pad // tile_b,),
        in_specs=[
            pl.BlockSpec((tile_b, seq_len), lambda i: (i, 0)),           # tokens tile
            pl.BlockSpec(kp["emb"].shape, lambda i: (0, 0)),
            pl.BlockSpec(kp["w1_prefix"].shape, lambda i: (0, 0)),
            pl.BlockSpec(kp["w1_emb"].shape, lambda i: (0, 0, 0)),
            pl.BlockSpec(kp["b1"].shape, lambda i: (0, 0)),
            pl.BlockSpec(kp["w2"].shape, lambda i: (0, 0)),
            pl.BlockSpec(kp["b2"].shape, lambda i: (0, 0)),
            pl.BlockSpec(kp["w3"].shape, lambda i: (0, 0)),
            pl.BlockSpec(kp["b3"].shape, lambda i: (0, 0)),
        ],
        out_specs=pl.BlockSpec((tile_b, out_pad), lambda i: (i, 0)),
        compiler_params=pltpu.CompilerParams(
            dimension_semantics=("parallel",)),  # batch grid: shards across TCs on v7x
    )(tok2d, kp["emb"], kp["w1_prefix"], kp["w1_emb"], kp["b1"],
      kp["w2"], kp["b2"], kp["w3"], kp["b3"])

    out = out[:b, :output_size]
    return out[0] if single else out


# --------------------------------------------------------------------------- reference
def policy_forward_ref(tokens, params):
    """Pure-JAX mirror of the PyTorch Policy.forward for one 1-D token sequence."""
    x = jnp.concatenate([
        tokens[:N_PREFIX].astype(jnp.float32),
        jnp.take(params["emb"], tokens[N_PREFIX:], axis=0).reshape(-1),
    ])
    h1 = jax.nn.relu(x @ params["w1"].T + params["b1"])
    h2 = jax.nn.sigmoid(h1 @ params["w2"].T + params["b2"])
    z3 = h2 @ params["w3"].T + params["b3"]
    return jax.nn.softmax(z3, axis=0)


if __name__ == "__main__":
    vocab_size = 16
    emb_size = 8
    seq_len = 9                                               # 5 raw ints + 4 embedded tokens
    input_size = N_PREFIX + (seq_len - N_PREFIX) * emb_size   # 37
    hidden_size = 32
    output_size = 6
    batch = 16                                                # 2 grid steps of tile_b=8

    key = jax.random.PRNGKey(0)
    k_params, k_tokens = jax.random.split(key)
    params = make_policy_params(k_params, vocab_size, emb_size,
                                input_size, hidden_size, output_size)
    kp, out_size = prepare_kernel_params(params)

    tokens = jax.random.randint(k_tokens, (batch, seq_len), 0, vocab_size, dtype=jnp.int32)

    # batched forward
    y = jax.block_until_ready(policy_forward(tokens, kp, output_size=out_size))
    y_ref = jax.vmap(lambda t: policy_forward_ref(t, params))(tokens)

    assert y.shape == (batch, output_size)
    assert bool(jnp.isfinite(y).all())
    assert bool(jnp.all(jnp.abs(jnp.sum(y, axis=-1) - 1.0) < 5e-3))
    assert bool(jnp.allclose(y, y_ref, atol=2e-3, rtol=2e-3))

    # single-sequence path (matches the original module's 1-D forward)
    y1 = jax.block_until_ready(policy_forward(tokens[0], kp, output_size=out_size))
    assert y1.shape == (output_size,)
    assert bool(jnp.allclose(y1, y_ref[0], atol=2e-3, rtol=2e-3))

    print("KERNEL_OK")
</pallas_src>

<mosaic_0001>
module attributes {stable_mosaic.version = 11 : i64} {
  func.func @policy_kernel(%arg0: i32, %arg1: memref<8x9xi32, #tpu.memory_space<vmem>>, %arg2: memref<16x8xf32, #tpu.memory_space<vmem>>, %arg3: memref<8x32xf32, #tpu.memory_space<vmem>>, %arg4: memref<4x8x32xf32, #tpu.memory_space<vmem>>, %arg5: memref<1x32xf32, #tpu.memory_space<vmem>>, %arg6: memref<32x16xf32, #tpu.memory_space<vmem>>, %arg7: memref<1x16xf32, #tpu.memory_space<vmem>>, %arg8: memref<16x128xf32, #tpu.memory_space<vmem>>, %arg9: memref<1x128xf32, #tpu.memory_space<vmem>>, %arg10: memref<8x128xf32, #tpu.memory_space<vmem>>) attributes {dimension_semantics = [#tpu.dimension_semantics<parallel>], iteration_bounds = array<i64: 2>, scalar_prefetch = 0 : i64, scratch_operands = 0 : i64, tpu.core_type = #tpu.core_type<tc>, window_params = [{transform_indices = @transform_0, window_bounds = array<i64: 8, 9>}, {pipeline_mode = #tpu.pipeline_mode<synchronous>, transform_indices = @transform_1, window_bounds = array<i64: 16, 8>}, {pipeline_mode = #tpu.pipeline_mode<synchronous>, transform_indices = @transform_2, window_bounds = array<i64: 8, 32>}, {pipeline_mode = #tpu.pipeline_mode<synchronous>, transform_indices = @transform_3, window_bounds = array<i64: 4, 8, 32>}, {pipeline_mode = #tpu.pipeline_mode<synchronous>, transform_indices = @transform_4, window_bounds = array<i64: 1, 32>}, {pipeline_mode = #tpu.pipeline_mode<synchronous>, transform_indices = @transform_5, window_bounds = array<i64: 32, 16>}, {pipeline_mode = #tpu.pipeline_mode<synchronous>, transform_indices = @transform_6, window_bounds = array<i64: 1, 16>}, {pipeline_mode = #tpu.pipeline_mode<synchronous>, transform_indices = @transform_7, window_bounds = array<i64: 16, 128>}, {pipeline_mode = #tpu.pipeline_mode<synchronous>, transform_indices = @transform_8, window_bounds = array<i64: 1, 128>}, {transform_indices = @transform_9, window_bounds = array<i64: 8, 128>}]} {
    %c0 = arith.constant 0 : index
    %c0_0 = arith.constant 0 : index
    %0 = vector.load %arg1[%c0, %c0_0] : memref<8x9xi32, #tpu.memory_space<vmem>>, vector<8x9xi32>
    %1 = vector.extract_strided_slice %0 {offsets = [0, 0], sizes = [8, 8], strides = [1, 1]} : vector<8x9xi32> to vector<8x8xi32>
    %2 = arith.sitofp %1 : vector<8x8xi32> to vector<8x8xf32>
    %c0_1 = arith.constant 0 : index
    %c0_2 = arith.constant 0 : index
    %3 = vector.load %arg3[%c0_1, %c0_2] : memref<8x32xf32, #tpu.memory_space<vmem>>, vector<8x32xf32>
    %cst = arith.constant dense<0.000000e+00> : vector<8x32xf32>
    %4 = tpu.matmul %2, %3, %cst {dimension_numbers = #tpu.dot_dimension_numbers<[1], [0], [0], [1], [0, 0, 1, 1], [], []>} : vector<8x8xf32>, vector<8x32xf32>, vector<8x32xf32> -> vector<8x32xf32>
    %c0_3 = arith.constant 0 : index
    %c0_4 = arith.constant 0 : index
    %5 = vector.load %arg2[%c0_3, %c0_4] : memref<16x8xf32, #tpu.memory_space<vmem>>, vector<16x8xf32>
    %6 = vector.extract_strided_slice %0 {offsets = [0, 5], sizes = [8, 1], strides = [1, 1]} : vector<8x9xi32> to vector<8x1xi32>
    %7 = tpu.iota {dimensions = array<i32: 1>} : vector<8x16xi32>
    %8 = vector.broadcast %6 : vector<8x1xi32> to vector<8x16xi32>
    %9 = arith.cmpi eq, %8, %7 : vector<8x16xi32>
    %10 = arith.extui %9 : vector<8x16xi1> to vector<8x16xi32>
    %11 = arith.sitofp %10 : vector<8x16xi32> to vector<8x16xf32>
    %cst_5 = arith.constant dense<0.000000e+00> : vector<8x8xf32>
    %12 = tpu.matmul %11, %5, %cst_5 {dimension_numbers = #tpu.dot_dimension_numbers<[1], [0], [0], [1], [0, 0, 1, 1], [], []>} : vector<8x16xf32>, vector<16x8xf32>, vector<8x8xf32> -> vector<8x8xf32>
    %c0_6 = arith.constant 0 : index
    %c0_7 = arith.constant 0 : index
    %c0_8 = arith.constant 0 : index
    %13 = vector.load %arg4[%c0_6, %c0_7, %c0_8] : memref<4x8x32xf32, #tpu.memory_space<vmem>>, vector<1x8x32xf32>
    %14 = vector.shape_cast %13 : vector<1x8x32xf32> to vector<8x32xf32>
    %cst_9 = arith.constant dense<0.000000e+00> : vector<8x32xf32>
    %15 = tpu.matmul %12, %14, %cst_9 {dimension_numbers = #tpu.dot_dimension_numbers<[1], [0], [0], [1], [0, 0, 1, 1], [], []>} : vector<8x8xf32>, vector<8x32xf32>, vector<8x32xf32> -> vector<8x32xf32>
    %16 = arith.addf %4, %15 : vector<8x32xf32>
    %17 = vector.extract_strided_slice %0 {offsets = [0, 6], sizes = [8, 1], strides = [1, 1]} : vector<8x9xi32> to vector<8x1xi32>
    %18 = tpu.iota {dimensions = array<i32: 1>} : vector<8x16xi32>
    %19 = vector.broadcast %17 : vector<8x1xi32> to vector<8x16xi32>
    %20 = arith.cmpi eq, %19, %18 : vector<8x16xi32>
    %21 = arith.extui %20 : vector<8x16xi1> to vector<8x16xi32>
    %22 = arith.sitofp %21 : vector<8x16xi32> to vector<8x16xf32>
    %cst_10 = arith.constant dense<0.000000e+00> : vector<8x8xf32>
    %23 = tpu.matmul %22, %5, %cst_10 {dimension_numbers = #tpu.dot_dimension_numbers<[1], [0], [0], [1], [0, 0, 1, 1], [], []>} : vector<8x16xf32>, vector<16x8xf32>, vector<8x8xf32> -> vector<8x8xf32>
    %c1 = arith.constant 1 : index
    %c0_11 = arith.constant 0 : index
    %c0_12 = arith.constant 0 : index
    %24 = vector.load %arg4[%c1, %c0_11, %c0_12] : memref<4x8x32xf32, #tpu.memory_space<vmem>>, vector<1x8x32xf32>
    %25 = vector.shape_cast %24 : vector<1x8x32xf32> to vector<8x32xf32>
    %cst_13 = arith.constant dense<0.000000e+00> : vector<8x32xf32>
    %26 = tpu.matmul %23, %25, %cst_13 {dimension_numbers = #tpu.dot_dimension_numbers<[1], [0], [0], [1], [0, 0, 1, 1], [], []>} : vector<8x8xf32>, vector<8x32xf32>, vector<8x32xf32> -> vector<8x32xf32>
    %27 = arith.addf %16, %26 : vector<8x32xf32>
    %28 = vector.extract_strided_slice %0 {offsets = [0, 7], sizes = [8, 1], strides = [1, 1]} : vector<8x9xi32> to vector<8x1xi32>
    %29 = tpu.iota {dimensions = array<i32: 1>} : vector<8x16xi32>
    %30 = vector.broadcast %28 : vector<8x1xi32> to vector<8x16xi32>
    %31 = arith.cmpi eq, %30, %29 : vector<8x16xi32>
    %32 = arith.extui %31 : vector<8x16xi1> to vector<8x16xi32>
    %33 = arith.sitofp %32 : vector<8x16xi32> to vector<8x16xf32>
    %cst_14 = arith.constant dense<0.000000e+00> : vector<8x8xf32>
    %34 = tpu.matmul %33, %5, %cst_14 {dimension_numbers = #tpu.dot_dimension_numbers<[1], [0], [0], [1], [0, 0, 1, 1], [], []>} : vector<8x16xf32>, vector<16x8xf32>, vector<8x8xf32> -> vector<8x8xf32>
    %c2 = arith.constant 2 : index
    %c0_15 = arith.constant 0 : index
    %c0_16 = arith.constant 0 : index
    %35 = vector.load %arg4[%c2, %c0_15, %c0_16] : memref<4x8x32xf32, #tpu.memory_space<vmem>>, vector<1x8x32xf32>
    %36 = vector.shape_cast %35 : vector<1x8x32xf32> to vector<8x32xf32>
    %cst_17 = arith.constant dense<0.000000e+00> : vector<8x32xf32>
    %37 = tpu.matmul %34, %36, %cst_17 {dimension_numbers = #tpu.dot_dimension_numbers<[1], [0], [0], [1], [0, 0, 1, 1], [], []>} : vector<8x8xf32>, vector<8x32xf32>, vector<8x32xf32> -> vector<8x32xf32>
    %38 = arith.addf %27, %37 : vector<8x32xf32>
    %39 = vector.extract_strided_slice %0 {offsets = [0, 8], sizes = [8, 1], strides = [1, 1]} : vector<8x9xi32> to vector<8x1xi32>
    %40 = tpu.iota {dimensions = array<i32: 1>} : vector<8x16xi32>
    %41 = vector.broadcast %39 : vector<8x1xi32> to vector<8x16xi32>
    %42 = arith.cmpi eq, %41, %40 : vector<8x16xi32>
    %43 = arith.extui %42 : vector<8x16xi1> to vector<8x16xi32>
    %44 = arith.sitofp %43 : vector<8x16xi32> to vector<8x16xf32>
    %cst_18 = arith.constant dense<0.000000e+00> : vector<8x8xf32>
    %45 = tpu.matmul %44, %5, %cst_18 {dimension_numbers = #tpu.dot_dimension_numbers<[1], [0], [0], [1], [0, 0, 1, 1], [], []>} : vector<8x16xf32>, vector<16x8xf32>, vector<8x8xf32> -> vector<8x8xf32>
    %c3 = arith.constant 3 : index
    %c0_19 = arith.constant 0 : index
    %c0_20 = arith.constant 0 : index
    %46 = vector.load %arg4[%c3, %c0_19, %c0_20] : memref<4x8x32xf32, #tpu.memory_space<vmem>>, vector<1x8x32xf32>
    %47 = vector.shape_cast %46 : vector<1x8x32xf32> to vector<8x32xf32>
    %cst_21 = arith.constant dense<0.000000e+00> : vector<8x32xf32>
    %48 = tpu.matmul %45, %47, %cst_21 {dimension_numbers = #tpu.dot_dimension_numbers<[1], [0], [0], [1], [0, 0, 1, 1], [], []>} : vector<8x8xf32>, vector<8x32xf32>, vector<8x32xf32> -> vector<8x32xf32>
    %49 = arith.addf %38, %48 : vector<8x32xf32>
    %c0_22 = arith.constant 0 : index
    %c0_23 = arith.constant 0 : index
    %50 = vector.load %arg5[%c0_22, %c0_23] : memref<1x32xf32, #tpu.memory_space<vmem>>, vector<1x32xf32>
    %51 = vector.broadcast %50 : vector<1x32xf32> to vector<8x32xf32>
    %52 = arith.addf %49, %51 : vector<8x32xf32>
    %cst_24 = arith.constant 0.000000e+00 : f32
    %53 = vector.broadcast %cst_24 : f32 to vector<8x32xf32>
    %54 = arith.maximumf %52, %53 : vector<8x32xf32>
    %c0_25 = arith.constant 0 : index
    %c0_26 = arith.constant 0 : index
    %55 = vector.load %arg6[%c0_25, %c0_26] : memref<32x16xf32, #tpu.memory_space<vmem>>, vector<32x16xf32>
    %cst_27 = arith.constant dense<0.000000e+00> : vector<8x16xf32>
    %56 = tpu.matmul %54, %55, %cst_27 {dimension_numbers = #tpu.dot_dimension_numbers<[1], [0], [0], [1], [0, 0, 1, 1], [], []>} : vector<8x32xf32>, vector<32x16xf32>, vector<8x16xf32> -> vector<8x16xf32>
    %c0_28 = arith.constant 0 : index
    %c0_29 = arith.constant 0 : index
    %57 = vector.load %arg7[%c0_28, %c0_29] : memref<1x16xf32, #tpu.memory_space<vmem>>, vector<1x16xf32>
    %58 = vector.broadcast %57 : vector<1x16xf32> to vector<8x16xf32>
    %59 = arith.addf %56, %58 : vector<8x16xf32>
    %cst_30 = arith.constant 5.000000e-01 : f32
    %60 = vector.broadcast %cst_30 : f32 to vector<8x16xf32>
    %61 = arith.mulf %60, %59 : vector<8x16xf32>
    %62 = math.tanh %61 : vector<8x16xf32>
    %cst_31 = arith.constant 1.000000e+00 : f32
    %63 = vector.broadcast %cst_31 : f32 to vector<8x16xf32>
    %64 = arith.addf %62, %63 : vector<8x16xf32>
    %cst_32 = arith.constant 5.000000e-01 : f32
    %65 = vector.broadcast %cst_32 : f32 to vector<8x16xf32>
    %66 = arith.mulf %65, %64 : vector<8x16xf32>
    %c0_33 = arith.constant 0 : index
    %c0_34 = arith.constant 0 : index
    %67 = vector.load %arg8[%c0_33, %c0_34] : memref<16x128xf32, #tpu.memory_space<vmem>>, vector<16x128xf32>
    %cst_35 = arith.constant dense<0.000000e+00> : vector<8x128xf32>
    %68 = tpu.matmul %66, %67, %cst_35 {dimension_numbers = #tpu.dot_dimension_numbers<[1], [0], [0], [1], [0, 0, 1, 1], [], []>} : vector<8x16xf32>, vector<16x128xf32>, vector<8x128xf32> -> vector<8x128xf32>
    %c0_36 = arith.constant 0 : index
    %c0_37 = arith.constant 0 : index
    %69 = vector.load %arg9[%c0_36, %c0_37] : memref<1x128xf32, #tpu.memory_space<vmem>>, vector<1x128xf32>
    %70 = vector.broadcast %69 : vector<1x128xf32> to vector<8x128xf32>
    %71 = arith.addf %68, %70 : vector<8x128xf32>
    %72 = tpu.iota {dimensions = array<i32: 1>} : vector<8x128xi32>
    %c6_i32 = arith.constant 6 : i32
    %73 = vector.broadcast %c6_i32 : i32 to vector<8x128xi32>
    %74 = arith.cmpi slt, %72, %73 : vector<8x128xi32>
    %cst_38 = arith.constant -1.000000e+30 : f32
    %75 = vector.broadcast %cst_38 : f32 to vector<8x128xf32>
    %76 = arith.select %74, %71, %75 : vector<8x128xi1>, vector<8x128xf32>
    %cst_39 = arith.constant dense<0xFF800000> : vector<8xf32>
    %77 = vector.multi_reduction <maximumf>, %76, %cst_39 [1] : vector<8x128xf32> to vector<8xf32>
    %78 = vector.shape_cast %77 : vector<8xf32> to vector<8x1xf32>
    %79 = vector.broadcast %78 : vector<8x1xf32> to vector<8x128xf32>
    %80 = arith.subf %76, %79 : vector<8x128xf32>
    %81 = math.exp %80 : vector<8x128xf32>
    %cst_40 = arith.constant dense<0.000000e+00> : vector<8xf32>
    %82 = vector.multi_reduction <add>, %81, %cst_40 [1] : vector<8x128xf32> to vector<8xf32>
    %83 = vector.shape_cast %82 : vector<8xf32> to vector<8x1xf32>
    %84 = tpu.reciprocal %83 {approx = true} : vector<8x1xf32> -> vector<8x1xf32>
    %85 = vector.broadcast %84 : vector<8x1xf32> to vector<8x128xf32>
    %86 = arith.mulf %81, %85 : vector<8x128xf32>
    %c0_41 = arith.constant 0 : index
    %c0_42 = arith.constant 0 : index
    %87 = vector.load %arg10[%c0_41, %c0_42] : memref<8x128xf32, #tpu.memory_space<vmem>>, vector<8x128xf32>
    tpu.vector_store %arg10[%c0_41, %c0_42], %86 {strides = array<i32>} : memref<8x128xf32, #tpu.memory_space<vmem>>, vector<8x128xf32>,
    return
  }
  func.func @transform_0(%arg0: i32) -> (i32, i32) {
    %c0_i32 = arith.constant 0 : i32
    %c0_i32_0 = arith.constant 0 : i32
    return %arg0, %c0_i32 : i32, i32
  }
  func.func @transform_1(%arg0: i32) -> (i32, i32) {
    %c0_i32 = arith.constant 0 : i32
    %c0_i32_0 = arith.constant 0 : i32
    %c0_i32_1 = arith.constant 0 : i32
    return %c0_i32, %c0_i32_0 : i32, i32
  }
  func.func @transform_2(%arg0: i32) -> (i32, i32) {
    %c0_i32 = arith.constant 0 : i32
    %c0_i32_0 = arith.constant 0 : i32
    %c0_i32_1 = arith.constant 0 : i32
    return %c0_i32, %c0_i32_0 : i32, i32
  }
  func.func @transform_3(%arg0: i32) -> (i32, i32, i32) {
    %c0_i32 = arith.constant 0 : i32
    %c0_i32_0 = arith.constant 0 : i32
    %c0_i32_1 = arith.constant 0 : i32
    %c0_i32_2 = arith.constant 0 : i32
    return %c0_i32, %c0_i32_0, %c0_i32_1 : i32, i32, i32
  }
  func.func @transform_4(%arg0: i32) -> (i32, i32) {
    %c0_i32 = arith.constant 0 : i32
    %c0_i32_0 = arith.constant 0 : i32
    %c0_i32_1 = arith.constant 0 : i32
    return %c0_i32, %c0_i32_0 : i32, i32
  }
  func.func @transform_5(%arg0: i32) -> (i32, i32) {
    %c0_i32 = arith.constant 0 : i32
    %c0_i32_0 = arith.constant 0 : i32
    %c0_i32_1 = arith.constant 0 : i32
    return %c0_i32, %c0_i32_0 : i32, i32
  }
  func.func @transform_6(%arg0: i32) -> (i32, i32) {
    %c0_i32 = arith.constant 0 : i32
    %c0_i32_0 = arith.constant 0 : i32
    %c0_i32_1 = arith.constant 0 : i32
    return %c0_i32, %c0_i32_0 : i32, i32
  }
  func.func @transform_7(%arg0: i32) -> (i32, i32) {
    %c0_i32 = arith.constant 0 : i32
    %c0_i32_0 = arith.constant 0 : i32
    %c0_i32_1 = arith.constant 0 : i32
    return %c0_i32, %c0_i32_0 : i32, i32
  }
  func.func @transform_8(%arg0: i32) -> (i32, i32) {
    %c0_i32 = arith.constant 0 : i32
    %c0_i32_0 = arith.constant 0 : i32
    %c0_i32_1 = arith.constant 0 : i32
    return %c0_i32, %c0_i32_0 : i32, i32
  }
  func.func @transform_9(%arg0: i32) -> (i32, i32) {
    %c0_i32 = arith.constant 0 : i32
    %c0_i32_0 = arith.constant 0 : i32
    return %arg0, %c0_i32 : i32, i32
  }
}

</mosaic_0001>

<bundles_post_ra>
// kernel: policy_forward.1
= control target key start
LH: loop header
LB: loop body
LE: loop exit
PB: predicated region body
PF: predicated region fallthrough
CT: control target
= control target key end

     0   :  { %14 = vsyncpa [#allocation3], 0  ;;  %s1881_s0 = inlined_call_operand.vmem [shape: s32[16,9], index: 0, kind: input, shape index: {}]   ;;  %s1882_s1 = inlined_call_operand.vmem [shape: f32[16,8], index: 1, kind: input, shape index: {}]   ;;  %s1883_s2 = inlined_call_operand.hbm [shape: f32[8,32], index: 2, kind: input, shape index: {}]   ;;  %s1884_s3 = inlined_call_operand.vmem [shape: f32[4,8,32], index: 3, kind: input, shape index: {}]   ;;  %s1885_s4 = inlined_call_operand.vmem [shape: f32[1,32], index: 4, kind: input, shape index: {}]   ;;  %s1886_s5 = inlined_call_operand.vmem [shape: f32[32,16], index: 5, kind: input, shape index: {}]   ;;  %s1887_s6 = inlined_call_operand.hbm [shape: f32[1,16], index: 6, kind: input, shape index: {}]   ;;  %s1888_s7 = inlined_call_operand.vmem [shape: f32[16,128], index: 7, kind: input, shape index: {}]   ;;  %s1889_s8 = inlined_call_operand.hbm [shape: f32[1,128], index: 8, kind: input, shape index: {}]   ;;  %s1890_s9 = inlined_call_operand.vmem [shape: f32[16,128], index: 9, kind: output, shape index: {}]  }
   0x1   :  { %15 = vsyncpa [#allocation5], 0  ;;  %s1688_s30 = smov 0  }
   0x2 LB: > { %s1694_s10 = sadd.s32 4294967295, %s1627_s30   ;;  %p1344_p0 = scmp.ge.s32.totalorder %s1627_s30, 1  ;;  %s1627_s30 = sphi %s1688_s30, %s21_s30  }
   0x3   : > { %p246_p1 = scmp.lt.s32.totalorder %s1627_s30, 3  ;;  %p1891_p2 = scmp.eq.s32.totalorder %s1694_s10, 0 }
   0x4   : > { %s1629_s12 = smov [#allocation4]   ;;  %s1630_s14 = smov [#allocation2]  }
   0x5   : > { %p1699_p3 = pnand %p1344_p0, %p246_p1  ;;  %s282_s13 = sshll.u32 %s1629_s12, 4  ;;  %s283_s13 = int_to_ptr.vmem [resolvable:$true] %s282_s13 }
   0x6   : > { %s262_s15 = sshll.u32 %s1630_s14, 4  ;;  %s1631_s16 = smov [#allocation6]   ;;  %s263_s15 = int_to_ptr.vmem [resolvable:$true] %s262_s15 }
   0x7   : > { %s1893_s11 = scalar_select %p1699_p3, 1, 0 }
   0x8   : > { %p1491_p4 = pneg %p1699_p3  ;;  %s296_s17 = sshll.u32 %s1631_s16, 4  ;;  %s1711_s17 = int_to_ptr.vmem [resolvable:$true] %s296_s17 }
   0x9   : > { %s1546_s19 = scalar_lea.vmem %s283_s13, 16  ;;  %s1553_s20 = scalar_lea.vmem %s283_s13, 32 }
   0xa   : > { %p1707_p5 = pnand %p1891_p2, %p1491_p4  ;;  %p1547_p7 = scmp.ne.s32.totalorder %s283_s13, %s1546_s19 }
   0xb   : > { %p1554_p10 = scmp.lt.s32.totalorder %s283_s13, %s283_s13  ;;  %p1555_p11 = scmp.lt.s32.totalorder %s1553_s20, %s1546_s19 }
   0xc   : > { %p1537_p6 = pneg %p1707_p5 }
   0xd   : > { %p1556_p12 = por %p1555_p11, %p1554_p10 }
   0xe   : > { %p1549_p8 = pnand %p1547_p7, %p1537_p6 }
  0x10   : > { %p1550_p9 = pneg %p1549_p8 }
  0x12   : > { %p1557_p13 = pnand %p1556_p12, %p1550_p9 }
  0x14   : > { %1560 = shalt.err (!%p1557_p13)
}
  0x15   : > { %1497 = dma.hbm_to_vmem [thread:$0]  (!%p1707_p5), %s1887_s6, 16, %s283_s13, [#allocation5]  }
  0x16   : > { %s1572_s23 = scalar_lea.vmem %s263_s15, 128  ;;  %p1580_p7 = scmp.lt.s32.totalorder %s263_s15, %s263_s15 }
  0x17   : > { %p1573_p0 = scmp.ne.s32.totalorder %s263_s15, %s1572_s23  ;;  %p1581_p8 = scmp.lt.s32.totalorder %s1572_s23, %s1572_s23 }
  0x19   : > { %p1575_p1 = pnand %p1573_p0, %p1537_p6  ;;  %p1582_p2 = por %p1581_p8, %p1580_p7 }
  0x1b   : > { %p1576_p4 = pneg %p1575_p1 }
  0x1d   : > { %p1583_p3 = pnand %p1582_p2, %p1576_p4 }
  0x1f   : > { %1586 = shalt.err (!%p1583_p3)
}
  0x20   : > { %1494 = dma.hbm_to_vmem [thread:$0]  (!%p1707_p5), %s1883_s2, 128, %s263_s15, [#allocation3]  }
  0x21   : > { %s1598_s26 = scalar_lea.vmem %s1711_s17, 16  ;;  %s1605_s27 = scalar_lea.vmem %s1711_s17, 32 }
  0x22   : > { %p1599_p9 = scmp.ne.s32.totalorder %s1711_s17, %s1598_s26  ;;  %p1606_p2 = scmp.lt.s32.totalorder %s1711_s17, %s1711_s17 }
  0x23   : > { %p1607_p3 = scmp.lt.s32.totalorder %s1605_s27, %s1598_s26 }
  0x24   : > { %p1601_p10 = pnand %p1599_p9, %p1537_p6 }
  0x25   : > { %p1608_p12 = por %p1607_p3, %p1606_p2 }
  0x26   : > { %p1602_p11 = pneg %p1601_p10 }
  0x28   : > { %p1609_p13 = pnand %p1608_p12, %p1602_p11 }
  0x2a   : > { %1612 = shalt.err (!%p1609_p13)
}
  0x2b   : > { %1500 = dma.hbm_to_vmem [thread:$0]  (!%p1707_p5), %s1889_s8, 16, %s1711_s17, [#allocation5]  }
  0x2c   : > { %p1895_p0 = scmp.ne.s32.totalorder %s1893_s11, 0 }
  0x2d   : > { %p1896_p6 = scmp.eq.s32.totalorder (!%p1895_p0), %s1694_s10, 0 }
  0x2e   : > { %316 = sbr.rel (%p1895_p0) target bundleno = 1318 (0x526), region = 56 }
  0x33   : > { %1618 = dma.done.wait (%p1896_p6), [#allocation3], 128   ;;  %p1897_p1 = pmov %p1896_p6 }
  0x35   : > { %1620 = vsyncadd (%p1897_p1), [#allocation3], 4294967168  ;;  %p1898_p4 = pmov %p1897_p1 }
  0x36   : > { %p1899_p7 = pmov %p1897_p1 }
  0x37   : > { %1622 = dma.done.wait (%p1898_p4), [#allocation5], 32  }
  0x38   : > { %1624 = vsyncadd (%p1899_p7), [#allocation5], 4294967264  ;;  %p358_p8 = scmp.lt.s32.totalorder %s1694_s10, 1  ;;  %v1632_v0 = vmov 5   ;;  %v1633_v1 = vmov 7   ;;  %v1634_v2 = vmov 0.0   ;;  %v371_v9 = vlaneseq }
  0x39   : > { %1524 = vset.pattern.permute.xlu0 %v1632_v0  ;;  %1526 = vset.pattern.permute.xlu1 %v1633_v1  ;;  %vm1635_vm0 = vmmov 0   ;;  %v370_v4 = vld [vmem:[%s1882_s1 + $0x8] sm:$0xff]  ;;  %v369_v5 = vld [vmem:[%s1882_s1] sm:$0xff]  ;;  %v1636_v6 = vmov 6   ;;  %v1637_v7 = vmov 8   ;;  %vm379_vm1 = vcmask 130048  }
  0x3a   : > { %s1901_s10 = smov (!%p358_p8, %s1694_s10), 1  ;;  %1408 = vmatprep.subr.mxu0 %v1634_v2  ;;  %1415 = vmatprep.subr.mxu1 %v1634_v2  ;;  %v453_v8 = vld [vmem:[%s1884_s3] sm:$0xff]  ;;  %v1789_v10 = vand.u32 127, %v371_v9  ;;  %vm454_vm6 = vcmask 64512   ;;  %v1361_v23 = vld [vmem:[%s1884_s3 + $0x8] sm:$0xff]  ;;  %v1365_v26 = vld [vmem:[%s1884_s3 + $0x10] sm:$0xff] }
  0x3b   : > { %s1353_s11 = sshll.u32 %s1901_s10, 3  ;;  %1412 = vmatprep.mubr.msk.f32.mxu0 %vm1635_vm0, %v1634_v2  ;;  %1417 = vmatprep.mubr.msk.f32.mxu1 %vm1635_vm0, %v1634_v2  ;;  %v368_v19 = vld [vmem:[#allocation2] sm:$0xff]  ;;  %v1369_v29 = vld [vmem:[%s1884_s3 + $0x18] sm:$0xff]  ;;  %v1077_v33 = vld [vmem:[%s1886_s5 + $0x10] sm:$0xff]  ;;  %vm1086_vm7 = vcmask 261120  }
  0x3c   : > { %s361_s14 = scalar_lea.vmem %s1881_s0, %s1353_s11  ;;  %1409 = vmatpush3.msra.mxu0 %v370_v4  ;;  %1416 = vmatpush3.msra.mxu1 %v453_v8  ;;  %v1078_v32 = vld [vmem:[%s1886_s5 + $0x18] sm:$0xff]  ;;  %v1076_v34 = vld [vmem:[%s1886_s5 + $0x8] sm:$0xff]  ;;  %v1075_v35 = vld [vmem:[%s1886_s5] sm:$0xff]  ;;  %vm1246_vm8 = vcmp.lt.s32.totalorder %v1789_v10, 6  ;;  %s365_s25 = scalar_lea.vmem %s1890_s9, %s1353_s11 }
  0x3d   : > { %v1771_v3 = vld [vmem:[%s361_s14] sm:$0xff]  ;;  %1410 = vmatprep.subr.mxu0 %v1634_v2  ;;  %1420 = vmatprep.subr.mxu1 %v1634_v2  ;;  %v1165_v53 = vld [vmem:[%s1888_s7 + $0x8] sm:$0xff] }
  0x3e   : > { %374 = vperm.xlu0 %1524, %v1771_v3   ;;  %757 = vperm.xlu1 %1526, %v1771_v3   ;;  %v367_v21 = vcvt.s32.f32 %v1771_v3  ;;  %v1371_v48 = vld [vmem:[%s1885_s4] ss:$0 sm:$0xff]  ;;  %v1372_v55 = vld [vmem:[#allocation4] ss:$0 sm:$0xff]  ;;  %v1374_v63 = vld [vmem:[#allocation6] ss:$0 sm:$0xff] }
  0x3f   : > { %1411 = vmatpush3.msra.mxu0 %v369_v5  ;;  %v1164_v54 = vld [vmem:[%s1888_s7] sm:$0xff] }
  0x40   : > { %1425 = vmatprep.subr.mxu0 %v1634_v2 }
  0x42   : > { %1525 = vset.pattern.permute.xlu0 %v1636_v6  ;;  %1527 = vset.pattern.permute.xlu1 %v1637_v7 }
  0x43   : > { %602 = vperm.xlu0 %1525, %v1771_v3   ;;  %912 = vperm.xlu1 %1527, %v1771_v3  }
  0x47   : > { %1528 = vset.pattern.permute.xlu0 %v1637_v7 }
  0xb9   : > { %v375_v11 = vpop.permute.xlu0 %374  ;;  %v758_v12 = vpop.permute.xlu1 %757 }
  0xba   : > { %vm376_vm2 = vcmp.eq.s32.totalorder %v375_v11, %v1789_v10  ;;  %vm759_vm4 = vcmp.eq.s32.totalorder %v758_v12, %v1789_v10 }
  0xbb   : > { %v1355_v13 = vsel %vm376_vm2, 1.0, %v1634_v2  ;;  %v1363_v17 = vsel %vm759_vm4, 1.0, %v1634_v2 }
  0xbc   : > { %1413 = vmatmul.mubr.msk.f32.vlgmr.msra.gmra.mxu0 %vm379_vm1, %v1355_v13 }
  0xbd   : > { %1426 = vmatpush3.msra.mxu0 %v370_v4  ;;  %1429 = vmatprep.mubr.msk.f32.mxu0 %vm1635_vm0, %v1634_v2 }
  0xbe   : > { %v603_v14 = vpop.permute.xlu0 %602  ;;  %1427 = vmatprep.subr.mxu0 %v1634_v2  ;;  %v913_v16 = vpop.permute.xlu1 %912 }
  0xbf   : > { %vm604_vm3 = vcmp.eq.s32.totalorder %v603_v14, %v1789_v10  ;;  %1428 = vmatpush3.msra.mxu0 %v369_v5  ;;  %vm914_vm5 = vcmp.eq.s32.totalorder %v913_v16, %v1789_v10 }
  0xc0   : > { %v1359_v15 = vsel %vm604_vm3, 1.0, %v1634_v2  ;;  %1437 = vmatprep.subr.mxu0 %v1634_v2  ;;  %v1367_v18 = vsel %vm914_vm5, 1.0, %v1634_v2 }
  0xc1   : > { %1430 = vmatmul.mubr.msk.f32.vlgmr.msra.gmra.mxu0 %vm379_vm1, %v1359_v15 }
  0xc2   : > { %1438 = vmatpush3.msra.mxu0 %v370_v4  ;;  %1441 = vmatprep.mubr.msk.f32.mxu0 %vm1635_vm0, %v1634_v2 }
  0xc3   : > { %1439 = vmatprep.subr.mxu0 %v1634_v2 }
  0xc4   : > { %1440 = vmatpush3.msra.mxu0 %v369_v5 }
  0xc5   : > { %1442 = vmatmul.mubr.msk.f32.vlgmr.msra.gmra.mxu0 %vm379_vm1, %v1363_v17  ;;  %1449 = vmatprep.subr.mxu0 %v1634_v2 }
  0xc6   : > { %1450 = vmatpush3.msra.mxu0 %v370_v4  ;;  %1453 = vmatprep.mubr.msk.f32.mxu0 %vm1635_vm0, %v1634_v2 }
  0xc7   : > { %1451 = vmatprep.subr.mxu0 %v1634_v2 }
  0xc8   : > { %1452 = vmatpush3.msra.mxu0 %v369_v5 }
  0xc9   : > { %1454 = vmatmul.mubr.msk.f32.vlgmr.msra.gmra.mxu0 %vm379_vm1, %v1367_v18  ;;  %1461 = vmatprep.subr.mxu0 %v1634_v2 }
  0xca   : > { %1469 = vmatprep.mubr.msk.f32.mxu0 %vm1635_vm0, %v1634_v2  ;;  %1462 = vmatpush3.msra.mxu0 %v1078_v32 }
  0xcb   : > { %1463 = vmatprep.subr.mxu0 %v1634_v2 }
  0xcc   : > { %1464 = vmatpush3.msra.mxu0 %v1077_v33 }
  0xcd   : > { %1465 = vmatprep.subr.mxu0 %v1634_v2 }
  0xce   : > { %1466 = vmatpush3.msra.mxu0 %v1076_v34 }
  0xcf   : > { %1467 = vmatprep.subr.mxu0 %v1634_v2 }
  0xd0   : > { %1468 = vmatpush3.msra.mxu0 %v1075_v35 }
 0x17c   : > { %v449_v20 = vpop.f32.mrf.mxu0 }
 0x17d   : > { %1418 = vmatmul.mubr.msk.f32.vlgmr.msra.gmra.mxu1 %vm454_vm6, %v449_v20 }
 0x17e   : > { %1421 = vmatpush3.msra.mxu1 %v368_v19  ;;  %v1414_v22 = vpop.f32.mrf.mxu0  ;;  %1422 = vmatprep.mubr.msk.f32.mxu1 %vm1635_vm0, %v1634_v2 }
 0x17f   : > { %1432 = vmatprep.subr.mxu1 %v1634_v2 }
 0x181   : > { %1423 = vmatmul.mubr.msk.f32.vlgmr.msra.gmra.mxu1 %vm454_vm6, %v367_v21  ;;  %v676_v24 = vpop.f32.mrf.mxu0 }
 0x182   : > { %1433 = vmatpush3.msra.mxu1 %v1361_v23  ;;  %1434 = vmatprep.mubr.msk.f32.mxu1 %vm1635_vm0, %v1634_v2 }
 0x183   : > { %v1431_v25 = vpop.f32.mrf.mxu0  ;;  %1444 = vmatprep.subr.mxu1 %v1634_v2 }
 0x185   : > { %1435 = vmatmul.mubr.msk.f32.vlgmr.msra.gmra.mxu1 %vm454_vm6, %v676_v24  ;;  %v831_v27 = vpop.f32.mrf.mxu0 }
 0x186   : > { %1445 = vmatpush3.msra.mxu1 %v1365_v26  ;;  %1446 = vmatprep.mubr.msk.f32.mxu1 %vm1635_vm0, %v1634_v2 }
 0x187   : > { %v1443_v28 = vpop.f32.mrf.mxu0  ;;  %1456 = vmatprep.subr.mxu1 %v1634_v2 }
 0x189   : > { %1447 = vmatmul.mubr.msk.f32.vlgmr.msra.gmra.mxu1 %vm454_vm6, %v831_v27  ;;  %v986_v30 = vpop.f32.mrf.mxu0 }
 0x18a   : > { %1457 = vmatpush3.msra.mxu1 %v1369_v29  ;;  %1458 = vmatprep.mubr.msk.f32.mxu1 %vm1635_vm0, %v1634_v2 }
 0x18b   : > { %v1455_v31 = vpop.f32.mrf.mxu0  ;;  %1472 = vmatprep.subr.mxu1 %v1634_v2 }
 0x18d   : > { %1459 = vmatmul.mubr.msk.f32.vlgmr.msra.gmra.mxu1 %vm454_vm6, %v986_v30 }
 0x18e   : > { %1476 = vmatprep.mubr.msk.f32.mxu1 %vm1635_vm0, %v1634_v2  ;;  %1473 = vmatpush3.msra.mxu1 %v1165_v53 }
 0x18f   : > { %1474 = vmatprep.subr.mxu1 %v1634_v2 }
 0x190   : > { %1475 = vmatpush3.msra.mxu1 %v1164_v54 }
 0x23d   : > { %v524_v36 = vpop.f32.mrf.mxu1 }
 0x23f   : > { %v1419_v37 = vpop.f32.mrf.mxu1 }
 0x241   : > { %v597_v38 = vpop.f32.mrf.mxu1 }
 0x242   : > { %v598_v42 = vadd.f32 %v597_v38, %v524_v36 }
 0x243   : > { %v1424_v39 = vpop.f32.mrf.mxu1 }
 0x245   : > { %v751_v40 = vpop.f32.mrf.mxu1 }
 0x246   : > { %v755_v44 = vadd.f32 %v751_v40, %v598_v42 }
 0x247   : > { %v1436_v41 = vpop.f32.mrf.mxu1 }
 0x249   : > { %v906_v43 = vpop.f32.mrf.mxu1 }
 0x24a   : > { %v910_v46 = vadd.f32 %v906_v43, %v755_v44 }
 0x24b   : > { %v1448_v45 = vpop.f32.mrf.mxu1 }
 0x24d   : > { %v1061_v47 = vpop.f32.mrf.mxu1 }
 0x24e   : > { %v1065_v49 = vadd.f32 %v1061_v47, %v910_v46 }
 0x24f   : > { %v1460_v50 = vpop.f32.mrf.mxu1 }
 0x250   : > { %v1073_v51 = vadd.f32 %v1371_v48, %v1065_v49 }
 0x252   : > { %v1074_v52 = vmax.f32 %v1073_v51, 0.0 }
 0x254   : > { %1470 = vmatmul.mubr.msk.f32.vlgmr.msra.gmra.mxu0 %vm1086_vm7, %v1074_v52 }
 0x314   : > { %v1156_v56 = vpop.f32.mrf.mxu0 }
 0x315   : > { %v1157_v57 = vadd.f32 %v1372_v55, %v1156_v56 }
 0x316   : > { %v1471_v58 = vpop.f32.mrf.mxu0 }
 0x317   : > { %v1160_v59 = vmul.f32 0.5, %v1157_v57 }
 0x319   : > { %1529 = vtanh.f32 %v1160_v59 }
 0x326   : > { %v1530_v60 = vpop.eup %1529 }
 0x327   : > { %v1162_v61 = vadd.f32 1.0, %v1530_v60 }
 0x329   : > { %v1163_v62 = vmul.f32 0.5, %v1162_v61 }
 0x32b   : > { %1477 = vmatmul.mubr.msk.f32.vlgmr.msra.gmra.mxu1 %vm379_vm1, %v1163_v62 }
 0x3eb   : > { %v1242_v0 = vpop.f32.mrf.mxu1 }
 0x3ec   : > { %v1243_v1 = vadd.f32 %v1374_v63, %v1242_v0 }
 0x3ed   : > { %v1478_v2 = vpop.f32.mrf.mxu1 }
 0x3ee   : > { %v1247_v3 = vsel %vm1246_vm8, %v1243_v1, -1e+30 }
 0x3ef   : > { %1248 = vmax.xlane.f32.xlu1 %v1247_v3 }
 0x478   : > { %v1249_v4 = vpop.xlane.xlu1 %1248 }
 0x479   : > { %v1250_v5 = vsub.f32 %v1247_v3, %v1249_v4 }
 0x47b   : > { %v1251_v6 = vmul.f32 1.442695, %v1250_v5 }
 0x47d   : > { %1531 = vpow2.f32 %v1251_v6 }
 0x48a   : > { %v1532_v7 = vpop.eup %1531 }
 0x48b   : > { %1253 = vadd.xlane.f32.xlu0 %v1532_v7 }
 0x514   : > { %v1254_v8 = vpop.xlane.xlu0 %1253 }
 0x515   : > { %1533 = vrcp.f32 %v1254_v8 }
 0x522   : > { %v1534_v9 = vpop.eup %1533 }
 0x523   : > { %v1256_v11 = vmul.f32 %v1534_v9, %v1532_v7 }
 0x525   : > { %1257 = vst [vmem:[%s365_s25] sm:$0xff] %v1256_v11 }
 0x526 PF: > { %s21_s30 = sadd.s32 1, %s1627_s30  }
 0x527   : > { %p18_p5 = scmp.ge.s32.totalorder %s21_s30, 4  }
 0x529   :  { %20 = sbr.rel (!%p18_p5) target bundleno = 2 (0x2), region = 102 }
 0x52e   :  { %1277 = vsyncpa [#allocation3], 1 }
 0x52f   :  { %1279 = vsyncpa [#allocation3 + $0x1], 1 }
 0x530   :  { %1280 = vsyncpa [#allocation5], 1 }

</bundles_post_ra>
